<compile_context>
chip_gen: v7x
topology: tpu7x:2x2x1
jax: 0.10.0
libtpu: 0.0.40
codegen_flags: <defaults>
</compile_context>

<pallas_src>
import functools

import jax
import jax.numpy as jnp
from jax import lax
from jax.experimental import pallas as pl
from jax.experimental.pallas import tpu as pltpu


def _round_up(n, m):
    return ((n + m - 1) // m) * m


@functools.lru_cache(maxsize=1)
def _vmem_capacity_bytes():
    """Physical per-core VMEM (generation-aware), with a conservative fallback."""
    try:
        info = pltpu.get_tpu_info()
        for name in ("vmem_capacity_bytes", "vmem_bytes", "vmem_size_bytes"):
            v = getattr(info, name, None)
            if v:
                return int(v)
    except Exception:
        pass
    return 64 << 20  # v7x per-TensorCore size -> safe on every generation


# --------------------------------------------------------------------------
# Kernel
# --------------------------------------------------------------------------
def expert_kernel(x_ref, w1_ref, b1_ref, w2_ref, b2_ref, o_ref, acc_ref):
    """One (token-tile, I-tile) step of  y = ReLU(x @ W1 + b1) @ W2 + b2.

    x_ref : [TILE_T, Hp]     w1_ref: [Hp, TILE_I]   b1_ref: [1, TILE_I] (f32)
    w2_ref: [TILE_I, Hp]     b2_ref: [1, Hp] (f32)
    o_ref : [TILE_T, Hp]     acc_ref: [TILE_T, Hp] f32 scratch
    """
    k = pl.program_id(1)

    @pl.when(k == 0)
    def _():
        acc_ref[...] = jnp.zeros_like(acc_ref)

    # Feed the MXU in the (bf16) compute dtype; accumulate in f32.
    x = x_ref[...].astype(w1_ref.dtype)
    h = jnp.dot(x, w1_ref[...], preferred_element_type=jnp.float32)
    h = jnp.maximum(h + b1_ref[...], 0.0)
    acc_ref[...] += jnp.dot(h.astype(w2_ref.dtype), w2_ref[...],
                            preferred_element_type=jnp.float32)

    @pl.when(k == pl.num_programs(1) - 1)
    def _():
        o_ref[...] = (acc_ref[...] + b2_ref[...]).astype(o_ref.dtype)


# --------------------------------------------------------------------------
# One-time parameter repack (do at load time, NOT per call)
# --------------------------------------------------------------------------
def prepare_expert_params(w1, b1, w2, b2, *, compute_dtype=jnp.bfloat16,
                          max_tile_i=512):
    """PyTorch nn.Linear stores weight as [out, in]; kernel wants lane-dense
    [in, out], padded to multiples of 128.  I is additionally padded to a
    multiple of max_tile_i so the reduction tile never degenerates.
    Weights are stored in compute_dtype (bf16 -> MXU peak, half the DMA
    bytes); biases stay f32 since they are added to the f32 accumulator."""
    I, H = w1.shape
    Hp = _round_up(H, 128)
    Ip = _round_up(I, 128)
    if Ip > max_tile_i:
        Ip = _round_up(Ip, max_tile_i)

    w1_t = jnp.zeros((Hp, Ip), compute_dtype).at[:H, :I].set(w1.T.astype(compute_dtype))
    w2_t = jnp.zeros((Ip, Hp), compute_dtype).at[:I, :H].set(w2.T.astype(compute_dtype))
    b1_p = jnp.zeros((1, Ip), jnp.float32).at[0, :I].set(b1.astype(jnp.float32))
    b2_p = jnp.zeros((1, Hp), jnp.float32).at[0, :H].set(b2.astype(jnp.float32))
    return (w1_t, b1_p, w2_t, b2_p), (H, I, Hp, Ip)


# --------------------------------------------------------------------------
# VMEM-aware tile selection (all static / trace-time Python)
# --------------------------------------------------------------------------
def _largest_tile_divisor(Ip, cap):
    cap = max(128, min(cap, Ip))
    best, t = 128, 128
    while t <= cap:
        if Ip % t == 0:
            best = t
        t += 128
    return best


def _vmem_footprint(tile_t, tile_i, Hp, x_bytes, w_bytes, out_bytes):
    dbl = 2 * (tile_t * Hp * x_bytes        # x tile
               + Hp * tile_i * w_bytes      # w1 tile
               + tile_i * 4                 # b1 tile (f32)
               + tile_i * Hp * w_bytes      # w2 tile
               + Hp * 4                     # b2 tile (f32)
               + tile_t * Hp * out_bytes)   # out tile
    acc = tile_t * Hp * 4                   # f32 accumulator scratch
    h = tile_t * tile_i * (4 + w_bytes)     # f32 h + its compute-dtype copy
    return dbl + acc + h


def _select_tiles(T, Hp, Ip, x_bytes, w_bytes, out_bytes,
                  tile_t_req, tile_i_req, vmem_budget):
    sublane = max(8, 32 // max(x_bytes, 1))          # 8 f32 / 16 bf16 / 32 int8
    tile_t = _round_up(min(tile_t_req, _round_up(T, sublane)), sublane)
    if T >= 2 * sublane:                              # keep both v7x cores busy
        tile_t = min(tile_t, _round_up((T + 1) // 2, sublane))
    tile_i = _largest_tile_divisor(Ip, tile_i_req)

    def fits(tt, ti):
        return _vmem_footprint(tt, ti, Hp, x_bytes, w_bytes, out_bytes) <= vmem_budget

    # Shrink tile_i first: tile_t sets the arithmetic intensity per weight byte.
    while not fits(tile_t, tile_i):
        if tile_i > 128:
            tile_i = _largest_tile_divisor(Ip, tile_i - 128)
        elif tile_t > sublane:
            tile_t = max(sublane, _round_up(tile_t // 2, sublane))
        else:
            break
    return tile_t, tile_i


# --------------------------------------------------------------------------
# Wrapper
# --------------------------------------------------------------------------
@functools.partial(jax.jit, static_argnames=("dims", "tile_t", "tile_i"))
def expert_network(x, params, dims, tile_t=512, tile_i=512):
    """x: [batch, seq, hidden]; params/dims from prepare_expert_params."""
    w1_t, b1_p, w2_t, b2_p = params
    H, I, Hp, Ip = dims
    B, S, _ = x.shape
    T = B * S

    x_bytes = jnp.dtype(x.dtype).itemsize
    w_bytes = jnp.dtype(w1_t.dtype).itemsize
    out_bytes = x_bytes

    vmem_cap = _vmem_capacity_bytes()
    vmem_budget = int(0.70 * vmem_cap)
    tile_t, tile_i = _select_tiles(T, Hp, Ip, x_bytes, w_bytes, out_bytes,
                                   tile_t, tile_i, vmem_budget)

    Tp = _round_up(T, tile_t)
    n_t = Tp // tile_t
    n_i = Ip // tile_i

    # --- activations: pad only when it is not a no-op ---------------------
    x2d = x.reshape(T, H)
    needs_pad = (Hp != H) or (Tp != T)
    x_p = (jnp.zeros((Tp, Hp), x.dtype).at[:T, :H].set(x2d) if needs_pad else x2d)

    footprint = _vmem_footprint(tile_t, tile_i, Hp, x_bytes, w_bytes, out_bytes)
    vmem_limit = min(int(0.90 * vmem_cap), max(int(1.25 * footprint), 8 << 20))

    cost = pl.CostEstimate(
        flops=4 * T * H * I,                     # two matmuls, 2*T*H*I each
        transcendentals=0,
        bytes_accessed=int(T * H * (x_bytes + out_bytes)
                           + n_t * 2 * Hp * Ip * w_bytes   # weights re-streamed per token tile
                           + n_t * (Ip + Hp) * 4),
    )

    # TODO(synk): if profiling on v5e/v6e still shows exposed weight DMA, add
    # pipeline_mode=pl.Buffered(3) on the w1/w2 BlockSpecs (won't fit v7x).
    out_p = pl.pallas_call(
        expert_kernel,
        out_shape=jax.ShapeDtypeStruct((Tp, Hp), x.dtype),
        grid_spec=pltpu.PrefetchScalarGridSpec(
            num_scalar_prefetch=0,
            grid=(n_t, n_i),
            in_specs=[
                pl.BlockSpec((tile_t, Hp), lambda t, k: (t, 0)),   # x
                pl.BlockSpec((Hp, tile_i), lambda t, k: (0, k)),   # w1
                pl.BlockSpec((1, tile_i), lambda t, k: (0, k)),    # b1
                pl.BlockSpec((tile_i, Hp), lambda t, k: (k, 0)),   # w2
                pl.BlockSpec((1, Hp), lambda t, k: (0, 0)),        # b2
            ],
            out_specs=pl.BlockSpec((tile_t, Hp), lambda t, k: (t, 0)),
            scratch_shapes=[pltpu.VMEM((tile_t, Hp), jnp.float32)],
        ),
        compiler_params=pltpu.CompilerParams(
            dimension_semantics=("parallel", "arbitrary"),
            vmem_limit_bytes=vmem_limit,
        ),
        cost_estimate=cost,
    )(x_p, w1_t, b1_p, w2_t, b2_p)

    out = out_p if not needs_pad else out_p[:T, :H]
    return out.reshape(B, S, H)


# TODO(synk): for ragged per-expert token counts (real MoE routing), switch to
# num_scalar_prefetch with per-expert offsets and gate empty tiles via pl.when.


# --------------------------------------------------------------------------
# References & tests
# --------------------------------------------------------------------------
def _reference_f32(x, w1, b1, w2, b2):
    h = jnp.maximum(jnp.dot(x, w1.T, precision=lax.Precision.HIGHEST) + b1, 0.0)
    return jnp.dot(h, w2.T, precision=lax.Precision.HIGHEST) + b2


def _reference_matched(x, w1, b1, w2, b2, compute_dtype):
    """Mirrors the kernel numerics: compute_dtype MXU inputs, f32 accumulate."""
    xc = x.astype(compute_dtype)
    h = jnp.dot(xc, w1.T.astype(compute_dtype),
                preferred_element_type=jnp.float32) + b1
    h = jnp.maximum(h, 0.0)
    y = jnp.dot(h.astype(compute_dtype), w2.T.astype(compute_dtype),
                preferred_element_type=jnp.float32) + b2
    return y.astype(x.dtype)


def _run_case(key, B, S, H, I, tile_t=512, tile_i=512,
              compute_dtype=jnp.bfloat16, atol_matched=1e-3, atol_f32=5e-2):
    kx, k1, kb1, k2, kb2 = jax.random.split(key, 5)
    x = jax.random.normal(kx, (B, S, H), dtype=jnp.float32)
    # PyTorch nn.Linear layout: weight is [out_features, in_features].
    w1 = jax.random.normal(k1, (I, H), dtype=jnp.float32) * 0.1
    b1 = jax.random.normal(kb1, (I,), dtype=jnp.float32) * 0.1
    w2 = jax.random.normal(k2, (H, I), dtype=jnp.float32) * 0.1
    b2 = jax.random.normal(kb2, (H,), dtype=jnp.float32) * 0.1

    params, dims = prepare_expert_params(w1, b1, w2, b2,
                                         compute_dtype=compute_dtype,
                                         max_tile_i=tile_i)
    out = expert_network(x, params, dims, tile_t=tile_t, tile_i=tile_i)
    jax.block_until_ready(out)
    assert out.shape == (B, S, H)

    ref_m = _reference_matched(x, w1, b1, w2, b2, compute_dtype)
    assert jnp.allclose(out, ref_m, atol=atol_matched, rtol=atol_matched), \
        "mismatch vs dtype-matched reference"

    ref_f = _reference_f32(x, w1, b1, w2, b2)
    assert jnp.allclose(out, ref_f, atol=atol_f32, rtol=atol_f32), \
        "mismatch vs f32 reference"


if __name__ == "__main__":
    key = jax.random.PRNGKey(0)
    k0, k1, k2 = jax.random.split(key, 3)

    # Small shapes consistent with the module: batch=2, seq=8, hidden=32,
    # intermediate=64 (single I tile after padding; 2 token tiles).
    _run_case(k0, B=2, S=8, H=32, I=64)

    # Larger case exercising multiple token tiles (incl. a padded tail) and a
    # multi-step I reduction (tile_i=128 -> 2 reduction steps).
    _run_case(k1, B=2, S=40, H=128, I=256, tile_t=32, tile_i=128)

    # f32 compute-dtype path (exact semantics of the PyTorch module).
    _run_case(k2, B=2, S=8, H=32, I=64, compute_dtype=jnp.float32,
              atol_matched=1e-2, atol_f32=1e-2)

    print("KERNEL_OK")
</pallas_src>

<mosaic_0001>
module attributes {stable_mosaic.version = 11 : i64} {
  func.func @expert_kernel(%arg0: i32, %arg1: i32, %arg2: memref<8x128xf32, #tpu.memory_space<vmem>>, %arg3: memref<128x128xbf16, #tpu.memory_space<vmem>>, %arg4: memref<1x128xf32, #tpu.memory_space<vmem>>, %arg5: memref<128x128xbf16, #tpu.memory_space<vmem>>, %arg6: memref<1x128xf32, #tpu.memory_space<vmem>>, %arg7: memref<8x128xf32, #tpu.memory_space<vmem>>, %arg8: memref<8x128xf32, #tpu.memory_space<vmem>>) attributes {dimension_semantics = [#tpu.dimension_semantics<parallel>, #tpu.dimension_semantics<arbitrary>], iteration_bounds = array<i64: 2, 1>, scalar_prefetch = 0 : i64, scratch_operands = 1 : i64, tpu.core_type = #tpu.core_type<tc>, window_params = [{transform_indices = @transform_0, window_bounds = array<i64: 8, 128>}, {transform_indices = @transform_1, window_bounds = array<i64: 128, 128>}, {transform_indices = @transform_2, window_bounds = array<i64: 1, 128>}, {transform_indices = @transform_3, window_bounds = array<i64: 128, 128>}, {pipeline_mode = #tpu.pipeline_mode<synchronous>, transform_indices = @transform_4, window_bounds = array<i64: 1, 128>}, {transform_indices = @transform_5, window_bounds = array<i64: 8, 128>}]} {
    %c0_i32 = arith.constant 0 : i32
    %0 = arith.cmpi eq, %arg1, %c0_i32 : i32
    %1 = arith.extui %0 : i1 to i32
    %c0_i32_0 = arith.constant 0 : i32
    %2 = arith.cmpi ne, %1, %c0_i32_0 : i32
    scf.if %2 {
      %cst_16 = arith.constant 0.000000e+00 : f32
      %21 = vector.broadcast %cst_16 : f32 to vector<8x128xf32>
      %c0_17 = arith.constant 0 : index
      %c0_18 = arith.constant 0 : index
      %22 = vector.load %arg8[%c0_17, %c0_18] : memref<8x128xf32, #tpu.memory_space<vmem>>, vector<8x128xf32>
      tpu.vector_store %arg8[%c0_17, %c0_18], %21 {strides = array<i32>} : memref<8x128xf32, #tpu.memory_space<vmem>>, vector<8x128xf32>,
    } else {
    }
    %c0 = arith.constant 0 : index
    %c0_1 = arith.constant 0 : index
    %3 = vector.load %arg2[%c0, %c0_1] : memref<8x128xf32, #tpu.memory_space<vmem>>, vector<8x128xf32>
    %4 = arith.truncf %3 : vector<8x128xf32> to vector<8x128xbf16>
    %c0_2 = arith.constant 0 : index
    %c0_3 = arith.constant 0 : index
    %5 = vector.load %arg3[%c0_2, %c0_3] : memref<128x128xbf16, #tpu.memory_space<vmem>>, vector<128x128xbf16>
    %cst = arith.constant dense<0.000000e+00> : vector<8x128xf32>
    %6 = tpu.matmul %4, %5, %cst {dimension_numbers = #tpu.dot_dimension_numbers<[1], [0], [0], [1], [0, 0, 1, 1], [], []>} : vector<8x128xbf16>, vector<128x128xbf16>, vector<8x128xf32> -> vector<8x128xf32>
    %c0_4 = arith.constant 0 : index
    %c0_5 = arith.constant 0 : index
    %7 = vector.load %arg4[%c0_4, %c0_5] : memref<1x128xf32, #tpu.memory_space<vmem>>, vector<1x128xf32>
    %8 = vector.broadcast %7 : vector<1x128xf32> to vector<8x128xf32>
    %9 = arith.addf %6, %8 : vector<8x128xf32>
    %cst_6 = arith.constant 0.000000e+00 : f32
    %10 = vector.broadcast %cst_6 : f32 to vector<8x128xf32>
    %11 = arith.maximumf %9, %10 : vector<8x128xf32>
    %c0_7 = arith.constant 0 : index
    %c0_8 = arith.constant 0 : index
    %12 = vector.load %arg8[%c0_7, %c0_8] : memref<8x128xf32, #tpu.memory_space<vmem>>, vector<8x128xf32>
    %13 = arith.truncf %11 : vector<8x128xf32> to vector<8x128xbf16>
    %c0_9 = arith.constant 0 : index
    %c0_10 = arith.constant 0 : index
    %14 = vector.load %arg5[%c0_9, %c0_10] : memref<128x128xbf16, #tpu.memory_space<vmem>>, vector<128x128xbf16>
    %cst_11 = arith.constant dense<0.000000e+00> : vector<8x128xf32>
    %15 = tpu.matmul %13, %14, %cst_11 {dimension_numbers = #tpu.dot_dimension_numbers<[1], [0], [0], [1], [0, 0, 1, 1], [], []>} : vector<8x128xbf16>, vector<128x128xbf16>, vector<8x128xf32> -> vector<8x128xf32>
    %16 = arith.addf %12, %15 : vector<8x128xf32>
    %c0_12 = arith.constant 0 : index
    %c0_13 = arith.constant 0 : index
    %17 = vector.load %arg8[%c0_12, %c0_13] : memref<8x128xf32, #tpu.memory_space<vmem>>, vector<8x128xf32>
    tpu.vector_store %arg8[%c0_12, %c0_13], %16 {strides = array<i32>} : memref<8x128xf32, #tpu.memory_space<vmem>>, vector<8x128xf32>,
    %c0_i32_14 = arith.constant 0 : i32
    %18 = arith.cmpi eq, %arg1, %c0_i32_14 : i32
    %19 = arith.extui %18 : i1 to i32
    %c0_i32_15 = arith.constant 0 : i32
    %20 = arith.cmpi ne, %19, %c0_i32_15 : i32
    scf.if %20 {
      %c0_16 = arith.constant 0 : index
      %c0_17 = arith.constant 0 : index
      %21 = vector.load %arg8[%c0_16, %c0_17] : memref<8x128xf32, #tpu.memory_space<vmem>>, vector<8x128xf32>
      %c0_18 = arith.constant 0 : index
      %c0_19 = arith.constant 0 : index
      %22 = vector.load %arg6[%c0_18, %c0_19] : memref<1x128xf32, #tpu.memory_space<vmem>>, vector<1x128xf32>
      %23 = vector.broadcast %22 : vector<1x128xf32> to vector<8x128xf32>
      %24 = arith.addf %21, %23 : vector<8x128xf32>
      %c0_20 = arith.constant 0 : index
      %c0_21 = arith.constant 0 : index
      %25 = vector.load %arg7[%c0_20, %c0_21] : memref<8x128xf32, #tpu.memory_space<vmem>>, vector<8x128xf32>
      tpu.vector_store %arg7[%c0_20, %c0_21], %24 {strides = array<i32>} : memref<8x128xf32, #tpu.memory_space<vmem>>, vector<8x128xf32>,
    } else {
    }
    return
  }
  func.func @transform_0(%arg0: i32, %arg1: i32) -> (i32, i32) {
    %c0_i32 = arith.constant 0 : i32
    %c0_i32_0 = arith.constant 0 : i32
    return %arg0, %c0_i32 : i32, i32
  }
  func.func @transform_1(%arg0: i32, %arg1: i32) -> (i32, i32) {
    %c0_i32 = arith.constant 0 : i32
    %c0_i32_0 = arith.constant 0 : i32
    return %c0_i32, %arg1 : i32, i32
  }
  func.func @transform_2(%arg0: i32, %arg1: i32) -> (i32, i32) {
    %c0_i32 = arith.constant 0 : i32
    %c0_i32_0 = arith.constant 0 : i32
    return %c0_i32, %arg1 : i32, i32
  }
  func.func @transform_3(%arg0: i32, %arg1: i32) -> (i32, i32) {
    %c0_i32 = arith.constant 0 : i32
    %c0_i32_0 = arith.constant 0 : i32
    return %arg1, %c0_i32 : i32, i32
  }
  func.func @transform_4(%arg0: i32, %arg1: i32) -> (i32, i32) {
    %c0_i32 = arith.constant 0 : i32
    %c0_i32_0 = arith.constant 0 : i32
    %c0_i32_1 = arith.constant 0 : i32
    return %c0_i32, %c0_i32_0 : i32, i32
  }
  func.func @transform_5(%arg0: i32, %arg1: i32) -> (i32, i32) {
    %c0_i32 = arith.constant 0 : i32
    %c0_i32_0 = arith.constant 0 : i32
    return %arg0, %c0_i32 : i32, i32
  }
}

</mosaic_0001>

<bundles_post_ra>
// kernel: expert_network.1
= control target key start
LH: loop header
LB: loop body
LE: loop exit
PB: predicated region body
PF: predicated region fallthrough
CT: control target
= control target key end

     0   :  { %10 = vsyncpa [#allocation4], 0  ;;  %s866_s18 = smov 0   ;;  %s868_s19 = smov 0   ;;  %s979_s0 = inlined_call_operand.vmem [shape: f32[16,128], index: 0, kind: input, shape index: {}]   ;;  %s980_s1 = inlined_call_operand.vmem [shape: bf16[128,128], index: 1, kind: input, shape index: {}]   ;;  %s981_s2 = inlined_call_operand.vmem [shape: f32[1,128], index: 2, kind: input, shape index: {}]   ;;  %s982_s3 = inlined_call_operand.hbm [shape: bf16[128,128], index: 3, kind: input, shape index: {}]   ;;  %s983_s4 = inlined_call_operand.vmem [shape: f32[1,128], index: 4, kind: input, shape index: {}]   ;;  %s984_s5 = inlined_call_operand.vmem [shape: f32[16,128], index: 5, kind: output, shape index: {}]  }
   0x1   :  { %s870_s20 = smov 0  }
   0x2 LB: > { %s631_s21 = sadd.s32 4294967295, %s829_s20   ;;  %s28_s22 = sadd.s32 1, %s825_s19  ;;  %s829_s20 = sphi %s870_s20, %s16_s20   ;;  %s825_s19 = sphi %s868_s19, %s994_s19   ;;  %s821_s18 = sphi %s866_s18, %s993_s18  }
   0x3   : > { %p30_p0 = scmp.ge.s32.totalorder %s28_s22, 2  ;;  %p633_p1 = scmp.ge.s32.totalorder %s829_s20, 1 }
   0x4   : > { %p184_p2 = scmp.lt.s32.totalorder %s829_s20, 3  ;;  %p891_p4 = scmp.eq.s32.totalorder %s631_s21, 0 }
   0x5   : > { %s996_s22 = smov (%p30_p0, %s28_s22), 0  ;;  %s831_s25 = smov [#allocation3]  }
   0x6   : > { %p887_p3 = pnand %p633_p1, %p184_p2  ;;  %s212_s26 = sshll.u32 %s831_s25, 4  ;;  %s213_s26 = int_to_ptr.vmem [resolvable:$true] %s212_s26 }
   0x7   : > { %s989_s24 = scalar_select %p891_p4, 1, 0 }
   0x8   : > { %s988_s23 = scalar_select %p887_p3, 1, 0 }
   0x9   : > { %p724_p5 = pneg %p887_p3  ;;  %s775_s30 = scalar_lea.hbm %s982_s3, 1024 }
   0xa   : > { %p776_p7 = scmp.ne.s32.totalorder %s982_s3, %s775_s30  ;;  %p782_p11 = scmp.lt.u32.totalorder %s775_s30, %s982_s3 }
   0xb   : > { %p899_p6 = pnand %p891_p4, %p724_p5 }
   0xd   : > { %p777_p8 = pneg %p899_p6 }
   0xf   : > { %p778_p9 = pnand %p777_p8, %p776_p7 }
  0x11   : > { %p779_p10 = pneg %p778_p9 }
  0x13   : > { %p784_p12 = pnand %p782_p11, %p779_p10 }
  0x15   : > { %787 = shalt.err (!%p784_p12)
}
  0x16   : > { %s788_s10 = scalar_lea.vmem %s213_s26, 1024  ;;  %p796_p2 = scmp.lt.s32.totalorder %s213_s26, %s213_s26 }
  0x17   : > { %p789_p13 = scmp.ne.s32.totalorder %s213_s26, %s788_s10  ;;  %p797_p5 = scmp.lt.s32.totalorder %s788_s10, %s788_s10 }
  0x19   : > { %p791_p0 = pnand %p789_p13, %p777_p8  ;;  %p798_p4 = por %p797_p5, %p796_p2 }
  0x1b   : > { %p792_p1 = pneg %p791_p0 }
  0x1d   : > { %p799_p3 = pnand %p798_p4, %p792_p1 }
  0x1f   : > { %802 = shalt.err (!%p799_p3)
}
  0x20   : > { %s832_s11 = smov 64   ;;  %s833_s12 = smov 4  }
  0x21   : > { %727 = dma.hbm_to_vmem [thread:$0]  (!%p899_p6), %s982_s3, 1024, %s213_s26, [#allocation4], %s832_s11, %s832_s11, %s833_s12  }
  0x22   : > { %p991_p7 = scmp.ne.s32.totalorder %s988_s23, 0 }
  0x23   : > { %p992_p9 = scmp.ne.s32.totalorder (!%p991_p7), %s989_s24, 0 }
  0x24   : > { %238 = sbr.rel (%p991_p7) target bundleno = 511 (0x1ff), region = 40 }
  0x2b   : > { %816 = dma.done.wait (%p992_p9), [#allocation4], 1024  }
  0x2c   : > { %818 = vsyncadd (%p992_p9), [#allocation4], 4294966272  ;;  %v834_v0 = vmov 0.0   ;;  %vm835_vm0 = vmmov 0   ;;  %v759_v1 = vld [vmem:[%s980_s1] sm:$0xff]   ;;  %v760_v2 = vld [vmem:[%s980_s1 + $0x8] sm:$0xff]  }
  0x2d   : > { %680 = vmatprep.subr.bf16.mxu0 %v834_v0  ;;  %696 = vmatprep.mubr.msk.bf16.mxu0 %vm835_vm0, %v834_v0  ;;  %v761_v3 = vld [vmem:[%s980_s1 + $0x10] sm:$0xff]   ;;  %v767_v4 = vld [vmem:[#allocation3] sm:$0xff]   ;;  %v762_v5 = vld [vmem:[%s980_s1 + $0x18] sm:$0xff]   ;;  %p271_p3 = scmp.lt.s32.totalorder %s821_s18, 1 }
  0x2e   : > { %700 = vmatprep.subr.bf16.mxu1 %v834_v0  ;;  %716 = vmatprep.mubr.msk.bf16.mxu1 %vm835_vm0, %v834_v0  ;;  %v768_v6 = vld [vmem:[#allocation3 + $0x8] sm:$0xff]   ;;  %v763_v7 = vld [vmem:[%s980_s1 + $0x20] sm:$0xff]   ;;  %v769_v8 = vld [vmem:[#allocation3 + $0x10] sm:$0xff]  }
  0x2f   : > { %681 = vmatpush3.bf16.msra.mxu0 %v759_v1  ;;  %701 = vmatpush3.bf16.msra.mxu1 %v767_v4  ;;  %s998_s18 = smov (!%p271_p3, %s821_s18), 1  ;;  %v764_v9 = vld [vmem:[%s980_s1 + $0x28] sm:$0xff]   ;;  %v770_v10 = vld [vmem:[#allocation3 + $0x18] sm:$0xff]   ;;  %v765_v11 = vld [vmem:[%s980_s1 + $0x30] sm:$0xff]  }
  0x30   : > { %682 = vmatprep.subr.bf16.mxu0 %v834_v0  ;;  %702 = vmatprep.subr.bf16.mxu1 %v834_v0  ;;  %s640_s6 = sshll.u32 %s998_s18, 3  ;;  %v771_v12 = vld [vmem:[#allocation3 + $0x20] sm:$0xff]   ;;  %v766_v13 = vld [vmem:[%s980_s1 + $0x38] sm:$0xff]   ;;  %v772_v15 = vld [vmem:[#allocation3 + $0x28] sm:$0xff]  }
  0x31   : > { %s274_s11 = scalar_lea.vmem %s979_s0, %s640_s6  ;;  %v773_v17 = vld [vmem:[#allocation3 + $0x30] sm:$0xff]   ;;  %v774_v18 = vld [vmem:[#allocation3 + $0x38] sm:$0xff]   ;;  %v642_v19 = vld [vmem:[%s981_s2] ss:$0 sm:$0xff]  ;;  %s286_s24 = scalar_lea.vmem %s984_s5, %s640_s6 }
  0x32   : > { %v293_v14 = vld [vmem:[%s274_s11] sm:$0xff] }
  0x33   : > { %683 = vmatpush3.bf16.msra.mxu0 %v760_v2  ;;  %703 = vmatpush3.bf16.msra.mxu1 %v768_v6  ;;  %v294_v16 = vpack.c.bf16 %v293_v14, %v293_v14  ;;  %v659_v27 = vld [vmem:[%s983_s4] ss:$0 sm:$0xff] }
  0x34   : > { %684 = vmatprep.subr.bf16.mxu0 %v834_v0  ;;  %704 = vmatprep.subr.bf16.mxu1 %v834_v0 }
  0x37   : > { %685 = vmatpush3.bf16.msra.mxu0 %v761_v3  ;;  %705 = vmatpush3.bf16.msra.mxu1 %v769_v8 }
  0x38   : > { %686 = vmatprep.subr.bf16.mxu0 %v834_v0  ;;  %706 = vmatprep.subr.bf16.mxu1 %v834_v0 }
  0x3b   : > { %687 = vmatpush3.bf16.msra.mxu0 %v762_v5  ;;  %707 = vmatpush3.bf16.msra.mxu1 %v770_v10 }
  0x3c   : > { %688 = vmatprep.subr.bf16.mxu0 %v834_v0  ;;  %708 = vmatprep.subr.bf16.mxu1 %v834_v0 }
  0x3f   : > { %689 = vmatpush3.bf16.msra.mxu0 %v763_v7  ;;  %709 = vmatpush3.bf16.msra.mxu1 %v771_v12 }
  0x40   : > { %690 = vmatprep.subr.bf16.mxu0 %v834_v0  ;;  %710 = vmatprep.subr.bf16.mxu1 %v834_v0 }
  0x43   : > { %691 = vmatpush3.bf16.msra.mxu0 %v764_v9  ;;  %711 = vmatpush3.bf16.msra.mxu1 %v772_v15 }
  0x44   : > { %692 = vmatprep.subr.bf16.mxu0 %v834_v0  ;;  %712 = vmatprep.subr.bf16.mxu1 %v834_v0 }
  0x47   : > { %693 = vmatpush3.bf16.msra.mxu0 %v765_v11  ;;  %713 = vmatpush3.bf16.msra.mxu1 %v773_v17 }
  0x48   : > { %694 = vmatprep.subr.bf16.mxu0 %v834_v0  ;;  %714 = vmatprep.subr.bf16.mxu1 %v834_v0 }
  0x4b   : > { %695 = vmatpush3.bf16.msra.mxu0 %v766_v13  ;;  %715 = vmatpush3.bf16.msra.mxu1 %v774_v18 }
  0x4e   : > { %697 = vmatmul.mubr.bf16.vlgmr.msra.gmra.mrb[0].mxu0 %v294_v16 }
 0x121   : > { %v400_v20 = vpop.f32.mrb[0].mxu0 }
 0x122   : > { %v401_v21 = vadd.f32 %v642_v19, %v400_v20  ;;  %v698_v22 = vpop.f32.mrb[1].mxu0 }
 0x123   : > { %v403_v23 = vpop.f32.mrb[2].mxu0 }
 0x124   : > { %v406_v24 = vmax.f32 %v401_v21, 0.0  ;;  %v699_v25 = vpop.f32.mrb[3].mxu0 }
 0x126   : > { %v408_v26 = vpack.c.bf16 %v406_v24, %v406_v24 }
 0x128   : > { %717 = vmatmul.mubr.bf16.vlgmr.msra.gmra.mrb[0].mxu1 %v408_v26 }
 0x1fb   : > { %v507_v28 = vpop.f32.mrb[0].mxu1 }
 0x1fc   : > { %v526_v29 = vadd.f32 %v659_v27, %v507_v28  ;;  %v718_v30 = vpop.f32.mrb[1].mxu1 }
 0x1fd   : > { %v510_v31 = vpop.f32.mrb[2].mxu1 }
 0x1fe   : > { %527 = vst [vmem:[%s286_s24] sm:$0xff] %v526_v29  ;;  %v719_v32 = vpop.f32.mrb[3].mxu1 }
 0x1ff PF: > { %s16_s20 = sadd.s32 1, %s829_s20   ;;  %s993_s18 = smov %s825_s19 }
 0x200   : > { %p13_p4 = scmp.ge.s32.totalorder %s16_s20, 4   ;;  %s994_s19 = smov %s996_s22 }
 0x202   :  { %15 = sbr.rel (!%p13_p4) target bundleno = 2 (0x2), region = 90 }
 0x209   :  { %547 = vsyncpa [#allocation4], 1 }
 0x20a   :  { %549 = vsyncpa [#allocation4 + $0x1], 1 }

</bundles_post_ra>
